<compile_context>
chip_gen: v7x
topology: tpu7x:2x2x1
jax: 0.10.0
libtpu: 0.0.40
codegen_flags: <defaults>
</compile_context>

<pallas_src>
import functools

import jax
import jax.numpy as jnp
import numpy as np
from jax import lax
from jax.experimental import pallas as pl
from jax.experimental.pallas import tpu as pltpu

BN_EPS = 1e-5


# ----------------------------------------------------------------------------
# One-time packing of PyTorch-layout weights into kernel-friendly form
# ----------------------------------------------------------------------------
def prepare_params(raw, *, k):
    c1 = raw["conv1_w"]                          # (Cmid, Cin, 1, 1)
    Cmid, Cin = int(c1.shape[0]), int(c1.shape[1])
    Cout = int(raw["conv2_w"].shape[0])
    # ConvTranspose2d weight (Cin_mid, Cout_mid, kh, kw) -> fused tap matrix:
    # rows = (tap, c_out), cols = c_in, i.e. wtap[(kh*k+kw)*Cmid + co, ci].
    wtap = jnp.transpose(raw["tp_w"], (2, 3, 1, 0)).reshape(k * k * Cmid, Cmid)
    return {
        "w1":   c1.reshape(Cmid, Cin).astype(jnp.bfloat16),            # (Cmid, Cin)
        "wtap": wtap.astype(jnp.bfloat16),                             # (k*k*Cmid, Cmid)
        "w3":   raw["conv2_w"].reshape(Cout, Cmid).astype(jnp.bfloat16),
        # packed BN params, columns = [gamma1, beta1, gamma2, beta2]
        "bn_mid": jnp.stack([raw["g1"], raw["b1"], raw["g2"], raw["b2"]], axis=1),
        # packed BN params for the output layer, columns = [gamma3, beta3]
        "bn_out": jnp.stack([raw["g3"], raw["b3"]], axis=1),
    }


# ----------------------------------------------------------------------------
# Fused Decoder forward: one Pallas kernel does all three stages
# ----------------------------------------------------------------------------
@functools.partial(jax.jit, static_argnames=("k", "s", "p", "op"))
def decoder_forward(x_nhwc, params, *, k, s, p, op):
    N, H, W, Cin = x_nhwc.shape
    Cmid = params["w1"].shape[0]
    Cout = params["w3"].shape[0]

    Ho = (H - 1) * s - 2 * p + k + op
    Wo = (W - 1) * s - 2 * p + k + op
    # LinkNet decoder configs satisfy k + op - 2p == s, which makes the
    # per-stride-phase output grid exactly the input grid (Ho == s*H), so no
    # output-validity masking or crop is required.
    assert k + op - 2 * p == s, "unsupported (kernel, stride, pad, out_pad) combo"
    assert Ho == s * H and Wo == s * W

    M1 = N * H * W                    # pixels into the transposed conv
    M2 = s * s * M1                   # pixels out of the transposed conv
    KKC = k * k * Cmid

    # ---- static tap geometry: phase, flat-pixel shift, input-validity mask --
    q = np.arange(M1)
    jh = (q % (H * W)) // W
    jw = q % W
    taps_by_phase = {(rh, rw): [] for rh in range(s) for rw in range(s)}
    mask_np = np.ones((k * k, M1), np.float32)
    shifts = []
    for kh in range(k):
        rh = (kh - p) % s
        dh = (kh - p - rh) // s
        for kw in range(k):
            rw = (kw - p) % s
            dw = (kw - p - rw) // s
            tap = kh * k + kw
            shift = -(dh * W + dw)            # contrib[q] = yt_tap[q + shift]
            ih, iw = jh - dh, jw - dw
            mask_np[tap] = ((ih >= 0) & (ih < H) & (iw >= 0) & (iw < W))
            taps_by_phase[(rh, rw)].append((tap, shift, bool(mask_np[tap].all())))
            shifts.append(shift)
    PL = max(0, -min(shifts))                 # left / right zero halos for the
    PR = max(0, max(shifts))                  # shifted flat-pixel reads
    masks = jnp.asarray(mask_np)              # (k*k, M1), lane-dense

    inv_m1 = 1.0 / float(M1)
    inv_m2 = 1.0 / float(M2)

    def kernel(x_ref, w1_ref, wtap_ref, w3_ref, bnm_ref, bno_ref, mask_ref,
               o_ref, ytp_ref, y2_ref):
        # ----- stage 1: 1x1 conv + BN(train) + ReLU, channels-major -----------
        y1 = jnp.dot(w1_ref[...], x_ref[...],
                     preferred_element_type=jnp.float32)            # (Cmid, M1)
        m1 = jnp.sum(y1, axis=1, keepdims=True) * inv_m1
        v1 = jnp.sum(y1 * y1, axis=1, keepdims=True) * inv_m1 - m1 * m1
        y1 = (y1 - m1) * lax.rsqrt(v1 + BN_EPS) * bnm_ref[:, 0:1] + bnm_ref[:, 1:2]
        y1 = jnp.maximum(y1, 0.0)

        # ----- stage 2: ConvTranspose2d, all k*k taps in ONE matmul -----------
        yt = jnp.dot(wtap_ref[...], y1.astype(jnp.bfloat16),
                     preferred_element_type=jnp.float32)            # (KKC, M1)
        # Stage tap outputs with zero halos so shifted reads stay in range.
        if PL > 0:
            ytp_ref[:, :PL] = jnp.zeros((KKC, PL), jnp.float32)
        if PR > 0:
            ytp_ref[:, PL + M1:] = jnp.zeros((KKC, PR), jnp.float32)
        ytp_ref[:, PL:PL + M1] = yt

        # Per stride-phase: sum shifted + masked taps in registers, store once.
        for rh in range(s):
            for rw in range(s):
                acc = None
                for tap, shift, always_valid in taps_by_phase[(rh, rw)]:
                    r0 = tap * Cmid
                    c = ytp_ref[r0:r0 + Cmid, PL + shift:PL + shift + M1]
                    if not always_valid:
                        c = c * mask_ref[tap:tap + 1, :]
                    acc = c if acc is None else acc + c
                if acc is None:
                    acc = jnp.zeros((Cmid, M1), jnp.float32)
                ph = rh * s + rw
                y2_ref[:, ph * M1:(ph + 1) * M1] = acc

        # BN(train) + ReLU over all output pixels (all valid for these configs)
        y2 = y2_ref[...]
        m2 = jnp.sum(y2, axis=1, keepdims=True) * inv_m2
        v2 = jnp.sum(y2 * y2, axis=1, keepdims=True) * inv_m2 - m2 * m2
        y2 = (y2 - m2) * lax.rsqrt(v2 + BN_EPS) * bnm_ref[:, 2:3] + bnm_ref[:, 3:4]
        y2 = jnp.maximum(y2, 0.0)

        # ----- stage 3: 1x1 conv + BN + ReLU, lane-dense (Cout, M2) output ----
        y3 = jnp.dot(w3_ref[...], y2.astype(jnp.bfloat16),
                     preferred_element_type=jnp.float32)            # (Cout, M2)
        m3 = jnp.sum(y3, axis=1, keepdims=True) * inv_m2
        v3 = jnp.sum(y3 * y3, axis=1, keepdims=True) * inv_m2 - m3 * m3
        y3 = (y3 - m3) * lax.rsqrt(v3 + BN_EPS) * bno_ref[:, 0:1] + bno_ref[:, 1:2]
        o_ref[...] = jnp.maximum(y3, 0.0)

    # channels-major, bf16 matmul operand (wrapper-side layout plumbing)
    x_cm = jnp.transpose(x_nhwc.reshape(M1, Cin)).astype(jnp.bfloat16)  # (Cin, M1)

    out = pl.pallas_call(
        kernel,
        out_shape=jax.ShapeDtypeStruct((Cout, M2), jnp.float32),
        grid=(1,),
        in_specs=[
            pl.BlockSpec((Cin, M1), lambda i: (0, 0)),
            pl.BlockSpec((Cmid, Cin), lambda i: (0, 0)),
            pl.BlockSpec((KKC, Cmid), lambda i: (0, 0)),
            pl.BlockSpec((Cout, Cmid), lambda i: (0, 0)),
            pl.BlockSpec((Cmid, 4), lambda i: (0, 0)),
            pl.BlockSpec((Cout, 2), lambda i: (0, 0)),
            pl.BlockSpec((k * k, M1), lambda i: (0, 0)),
        ],
        out_specs=pl.BlockSpec((Cout, M2), lambda i: (0, 0)),
        scratch_shapes=[
            pltpu.VMEM((KKC, PL + M1 + PR), jnp.float32),   # staged tap outputs
            pltpu.VMEM((Cmid, M2), jnp.float32),            # lane-dense y2
        ],
        compiler_params=pltpu.CompilerParams(
            dimension_semantics=("arbitrary",),
        ),
    )(x_cm, params["w1"], params["wtap"], params["w3"],
      params["bn_mid"], params["bn_out"], masks)

    # channels/phase-major -> NHWC de-interleave (crop is a no-op here).
    y = out.reshape(Cout, s, s, N, H, W)
    y = jnp.transpose(y, (3, 4, 1, 5, 2, 0)).reshape(N, s * H, s * W, Cout)
    return y[:, :Ho, :Wo, :]


# ----------------------------------------------------------------------------
# Pure-JAX reference (independent formulation) for a sanity check
# ----------------------------------------------------------------------------
def reference_forward(x_nhwc, raw, *, k, s, p, op):
    def bn_relu(y, g, b):
        mean = jnp.mean(y, axis=(0, 1, 2), keepdims=True)
        var = jnp.mean((y - mean) ** 2, axis=(0, 1, 2), keepdims=True)
        return jnp.maximum((y - mean) * lax.rsqrt(var + BN_EPS) * g + b, 0.0)

    Cmid, Cin = raw["conv1_w"].shape[0], raw["conv1_w"].shape[1]
    Cout = raw["conv2_w"].shape[0]
    w1 = raw["conv1_w"].reshape(Cmid, Cin)
    y1 = bn_relu(jnp.einsum("nhwc,dc->nhwd", x_nhwc, w1), raw["g1"], raw["b1"])
    rhs = jnp.transpose(raw["tp_w"][:, :, ::-1, ::-1], (2, 3, 0, 1))  # HWIO
    y2 = lax.conv_general_dilated(
        y1, rhs, window_strides=(1, 1),
        padding=((k - 1 - p, k - 1 - p + op), (k - 1 - p, k - 1 - p + op)),
        lhs_dilation=(s, s), rhs_dilation=(1, 1),
        dimension_numbers=("NHWC", "HWIO", "NHWC"))
    y2 = bn_relu(y2, raw["g2"], raw["b2"])
    w3 = raw["conv2_w"].reshape(Cout, Cmid)
    y3 = bn_relu(jnp.einsum("nhwc,dc->nhwd", y2, w3), raw["g3"], raw["b3"])
    return y3


# ----------------------------------------------------------------------------
if __name__ == "__main__":
    # Decoder(in_channels=16, out_channels=8, kernel_size=3, stride=2,
    #         padding=1, output_padding=1, bias=False)
    # Input equivalent to PyTorch NCHW (2, 16, 12, 12); we work in NHWC.
    N, H, W = 2, 12, 12
    Cin, Cout = 16, 8
    Cmid = Cin // 4
    k, s, p, op = 3, 2, 1, 1

    key = jax.random.PRNGKey(0)
    ks = jax.random.split(key, 10)
    raw = {
        "conv1_w": 0.2 * jax.random.normal(ks[0], (Cmid, Cin, 1, 1), jnp.float32),
        "tp_w":    0.2 * jax.random.normal(ks[1], (Cmid, Cmid, k, k), jnp.float32),
        "conv2_w": 0.2 * jax.random.normal(ks[2], (Cout, Cmid, 1, 1), jnp.float32),
        "g1": 1.0 + 0.1 * jax.random.normal(ks[3], (Cmid,), jnp.float32),
        "b1": 0.05 * jax.random.normal(ks[4], (Cmid,), jnp.float32),
        "g2": 1.0 + 0.1 * jax.random.normal(ks[5], (Cmid,), jnp.float32),
        "b2": 0.05 * jax.random.normal(ks[6], (Cmid,), jnp.float32),
        "g3": 1.0 + 0.1 * jax.random.normal(ks[7], (Cout,), jnp.float32),
        "b3": 0.05 * jax.random.normal(ks[8], (Cout,), jnp.float32),
    }
    params = prepare_params(raw, k=k)      # one-time weight / BN-param packing

    x = jax.random.normal(ks[9], (N, H, W, Cin), jnp.float32)   # NHWC

    out = jax.block_until_ready(decoder_forward(x, params, k=k, s=s, p=p, op=op))
    ref = jax.block_until_ready(reference_forward(x, raw, k=k, s=s, p=p, op=op))

    # bf16 MXU operands on both paths (default precision); 3e-2 covers it.
    np.testing.assert_allclose(np.asarray(out), np.asarray(ref), rtol=3e-2, atol=3e-2)

    expected = (N, (H - 1) * s - 2 * p + k + op, (W - 1) * s - 2 * p + k + op, Cout)
    assert out.shape == expected, (out.shape, expected)

    print("KERNEL_OK")
</pallas_src>

<mosaic_0001>
module attributes {stable_mosaic.version = 11 : i64} {
  func.func @kernel(%arg0: i32, %arg1: memref<16x288xbf16, #tpu.memory_space<vmem>>, %arg2: memref<4x16xbf16, #tpu.memory_space<vmem>>, %arg3: memref<36x4xbf16, #tpu.memory_space<vmem>>, %arg4: memref<8x4xbf16, #tpu.memory_space<vmem>>, %arg5: memref<4x4xf32, #tpu.memory_space<vmem>>, %arg6: memref<8x2xf32, #tpu.memory_space<vmem>>, %arg7: memref<9x288xf32, #tpu.memory_space<vmem>>, %arg8: memref<8x1152xf32, #tpu.memory_space<vmem>>, %arg9: memref<36x301xf32, #tpu.memory_space<vmem>>, %arg10: memref<4x1152xf32, #tpu.memory_space<vmem>>) attributes {dimension_semantics = [#tpu.dimension_semantics<arbitrary>], iteration_bounds = array<i64: 1>, scalar_prefetch = 0 : i64, scratch_operands = 2 : i64, tpu.core_type = #tpu.core_type<tc>, window_params = [{pipeline_mode = #tpu.pipeline_mode<synchronous>, transform_indices = @transform_0, window_bounds = array<i64: 16, 288>}, {pipeline_mode = #tpu.pipeline_mode<synchronous>, transform_indices = @transform_1, window_bounds = array<i64: 4, 16>}, {pipeline_mode = #tpu.pipeline_mode<synchronous>, transform_indices = @transform_2, window_bounds = array<i64: 36, 4>}, {pipeline_mode = #tpu.pipeline_mode<synchronous>, transform_indices = @transform_3, window_bounds = array<i64: 8, 4>}, {pipeline_mode = #tpu.pipeline_mode<synchronous>, transform_indices = @transform_4, window_bounds = array<i64: 4, 4>}, {pipeline_mode = #tpu.pipeline_mode<synchronous>, transform_indices = @transform_5, window_bounds = array<i64: 8, 2>}, {pipeline_mode = #tpu.pipeline_mode<synchronous>, transform_indices = @transform_6, window_bounds = array<i64: 9, 288>}, {pipeline_mode = #tpu.pipeline_mode<synchronous>, transform_indices = @transform_7, window_bounds = array<i64: 8, 1152>}]} {
    %c0 = arith.constant 0 : index
    %c0_0 = arith.constant 0 : index
    %0 = vector.load %arg2[%c0, %c0_0] : memref<4x16xbf16, #tpu.memory_space<vmem>>, vector<4x16xbf16>
    %c0_1 = arith.constant 0 : index
    %c0_2 = arith.constant 0 : index
    %1 = vector.load %arg1[%c0_1, %c0_2] : memref<16x288xbf16, #tpu.memory_space<vmem>>, vector<16x288xbf16>
    %cst = arith.constant dense<0.000000e+00> : vector<4x288xf32>
    %2 = tpu.matmul %0, %1, %cst {dimension_numbers = #tpu.dot_dimension_numbers<[1], [0], [0], [1], [0, 0, 1, 1], [], []>} : vector<4x16xbf16>, vector<16x288xbf16>, vector<4x288xf32> -> vector<4x288xf32>
    %cst_3 = arith.constant dense<0.000000e+00> : vector<4xf32>
    %3 = vector.multi_reduction <add>, %2, %cst_3 [1] : vector<4x288xf32> to vector<4xf32>
    %4 = vector.shape_cast %3 : vector<4xf32> to vector<4x1xf32>
    %cst_4 = arith.constant 0.00347222225 : f32
    %5 = vector.broadcast %cst_4 : f32 to vector<4x1xf32>
    %6 = arith.mulf %4, %5 : vector<4x1xf32>
    %7 = arith.mulf %2, %2 : vector<4x288xf32>
    %cst_5 = arith.constant dense<0.000000e+00> : vector<4xf32>
    %8 = vector.multi_reduction <add>, %7, %cst_5 [1] : vector<4x288xf32> to vector<4xf32>
    %9 = vector.shape_cast %8 : vector<4xf32> to vector<4x1xf32>
    %cst_6 = arith.constant 0.00347222225 : f32
    %10 = vector.broadcast %cst_6 : f32 to vector<4x1xf32>
    %11 = arith.mulf %9, %10 : vector<4x1xf32>
    %12 = arith.mulf %6, %6 : vector<4x1xf32>
    %13 = arith.subf %11, %12 : vector<4x1xf32>
    %14 = vector.broadcast %6 : vector<4x1xf32> to vector<4x288xf32>
    %15 = arith.subf %2, %14 : vector<4x288xf32>
    %cst_7 = arith.constant 9.99999974E-6 : f32
    %16 = vector.broadcast %cst_7 : f32 to vector<4x1xf32>
    %17 = arith.addf %13, %16 : vector<4x1xf32>
    %18 = math.rsqrt %17 : vector<4x1xf32>
    %19 = vector.broadcast %18 : vector<4x1xf32> to vector<4x288xf32>
    %20 = arith.mulf %15, %19 : vector<4x288xf32>
    %c0_8 = arith.constant 0 : index
    %c0_9 = arith.constant 0 : index
    %21 = vector.load %arg5[%c0_8, %c0_9] : memref<4x4xf32, #tpu.memory_space<vmem>>, vector<4x1xf32>
    %22 = vector.broadcast %21 : vector<4x1xf32> to vector<4x288xf32>
    %23 = arith.mulf %20, %22 : vector<4x288xf32>
    %c0_10 = arith.constant 0 : index
    %c1 = arith.constant 1 : index
    %24 = vector.load %arg5[%c0_10, %c1] : memref<4x4xf32, #tpu.memory_space<vmem>>, vector<4x1xf32>
    %25 = vector.broadcast %24 : vector<4x1xf32> to vector<4x288xf32>
    %26 = arith.addf %23, %25 : vector<4x288xf32>
    %cst_11 = arith.constant 0.000000e+00 : f32
    %27 = vector.broadcast %cst_11 : f32 to vector<4x288xf32>
    %28 = arith.maximumf %26, %27 : vector<4x288xf32>
    %c0_12 = arith.constant 0 : index
    %c0_13 = arith.constant 0 : index
    %29 = vector.load %arg3[%c0_12, %c0_13] : memref<36x4xbf16, #tpu.memory_space<vmem>>, vector<36x4xbf16>
    %30 = arith.truncf %28 : vector<4x288xf32> to vector<4x288xbf16>
    %cst_14 = arith.constant dense<0.000000e+00> : vector<36x288xf32>
    %31 = tpu.matmul %29, %30, %cst_14 {dimension_numbers = #tpu.dot_dimension_numbers<[1], [0], [0], [1], [0, 0, 1, 1], [], []>} : vector<36x4xbf16>, vector<4x288xbf16>, vector<36x288xf32> -> vector<36x288xf32>
    %cst_15 = arith.constant 0.000000e+00 : f32
    %32 = vector.broadcast %cst_15 : f32 to vector<36x13xf32>
    %c0_16 = arith.constant 0 : index
    %c288 = arith.constant 288 : index
    %33 = vector.load %arg9[%c0_16, %c288] : memref<36x301xf32, #tpu.memory_space<vmem>>, vector<36x13xf32>
    tpu.vector_store %arg9[%c0_16, %c288], %32 {strides = array<i32>} : memref<36x301xf32, #tpu.memory_space<vmem>>, vector<36x13xf32>,
    %c0_17 = arith.constant 0 : index
    %c0_18 = arith.constant 0 : index
    %34 = vector.load %arg9[%c0_17, %c0_18] : memref<36x301xf32, #tpu.memory_space<vmem>>, vector<36x288xf32>
    tpu.vector_store %arg9[%c0_17, %c0_18], %31 {strides = array<i32>} : memref<36x301xf32, #tpu.memory_space<vmem>>, vector<36x288xf32>,
    %c16 = arith.constant 16 : index
    %c0_19 = arith.constant 0 : index
    %35 = vector.load %arg9[%c16, %c0_19] : memref<36x301xf32, #tpu.memory_space<vmem>>, vector<4x288xf32>
    %c0_20 = arith.constant 0 : index
    %c0_21 = arith.constant 0 : index
    %36 = vector.load %arg10[%c0_20, %c0_21] : memref<4x1152xf32, #tpu.memory_space<vmem>>, vector<4x288xf32>
    tpu.vector_store %arg10[%c0_20, %c0_21], %35 {strides = array<i32>} : memref<4x1152xf32, #tpu.memory_space<vmem>>, vector<4x288xf32>,
    %c12 = arith.constant 12 : index
    %c1_22 = arith.constant 1 : index
    %37 = vector.load %arg9[%c12, %c1_22] : memref<36x301xf32, #tpu.memory_space<vmem>>, vector<4x288xf32>
    %c3 = arith.constant 3 : index
    %c0_23 = arith.constant 0 : index
    %38 = vector.load %arg7[%c3, %c0_23] : memref<9x288xf32, #tpu.memory_space<vmem>>, vector<1x288xf32>
    %39 = vector.broadcast %38 : vector<1x288xf32> to vector<4x288xf32>
    %40 = arith.mulf %37, %39 : vector<4x288xf32>
    %c20 = arith.constant 20 : index
    %c0_24 = arith.constant 0 : index
    %41 = vector.load %arg9[%c20, %c0_24] : memref<36x301xf32, #tpu.memory_space<vmem>>, vector<4x288xf32>
    %42 = arith.addf %40, %41 : vector<4x288xf32>
    %c0_25 = arith.constant 0 : index
    %c288_26 = arith.constant 288 : index
    %43 = vector.load %arg10[%c0_25, %c288_26] : memref<4x1152xf32, #tpu.memory_space<vmem>>, vector<4x288xf32>
    tpu.vector_store %arg10[%c0_25, %c288_26], %42 {strides = array<i32>} : memref<4x1152xf32, #tpu.memory_space<vmem>>, vector<4x288xf32>,
    %c4 = arith.constant 4 : index
    %c12_27 = arith.constant 12 : index
    %44 = vector.load %arg9[%c4, %c12_27] : memref<36x301xf32, #tpu.memory_space<vmem>>, vector<4x288xf32>
    %c1_28 = arith.constant 1 : index
    %c0_29 = arith.constant 0 : index
    %45 = vector.load %arg7[%c1_28, %c0_29] : memref<9x288xf32, #tpu.memory_space<vmem>>, vector<1x288xf32>
    %46 = vector.broadcast %45 : vector<1x288xf32> to vector<4x288xf32>
    %47 = arith.mulf %44, %46 : vector<4x288xf32>
    %c28 = arith.constant 28 : index
    %c0_30 = arith.constant 0 : index
    %48 = vector.load %arg9[%c28, %c0_30] : memref<36x301xf32, #tpu.memory_space<vmem>>, vector<4x288xf32>
    %49 = arith.addf %47, %48 : vector<4x288xf32>
    %c0_31 = arith.constant 0 : index
    %c576 = arith.constant 576 : index
    %50 = vector.load %arg10[%c0_31, %c576] : memref<4x1152xf32, #tpu.memory_space<vmem>>, vector<4x288xf32>
    tpu.vector_store %arg10[%c0_31, %c576], %49 {strides = array<i32>} : memref<4x1152xf32, #tpu.memory_space<vmem>>, vector<4x288xf32>,
    %c0_32 = arith.constant 0 : index
    %c13 = arith.constant 13 : index
    %51 = vector.load %arg9[%c0_32, %c13] : memref<36x301xf32, #tpu.memory_space<vmem>>, vector<4x288xf32>
    %c0_33 = arith.constant 0 : index
    %c0_34 = arith.constant 0 : index
    %52 = vector.load %arg7[%c0_33, %c0_34] : memref<9x288xf32, #tpu.memory_space<vmem>>, vector<1x288xf32>
    %53 = vector.broadcast %52 : vector<1x288xf32> to vector<4x288xf32>
    %54 = arith.mulf %51, %53 : vector<4x288xf32>
    %c8 = arith.constant 8 : index
    %c12_35 = arith.constant 12 : index
    %55 = vector.load %arg9[%c8, %c12_35] : memref<36x301xf32, #tpu.memory_space<vmem>>, vector<4x288xf32>
    %c2 = arith.constant 2 : index
    %c0_36 = arith.constant 0 : index
    %56 = vector.load %arg7[%c2, %c0_36] : memref<9x288xf32, #tpu.memory_space<vmem>>, vector<1x288xf32>
    %57 = vector.broadcast %56 : vector<1x288xf32> to vector<4x288xf32>
    %58 = arith.mulf %55, %57 : vector<4x288xf32>
    %59 = arith.addf %54, %58 : vector<4x288xf32>
    %c24 = arith.constant 24 : index
    %c1_37 = arith.constant 1 : index
    %60 = vector.load %arg9[%c24, %c1_37] : memref<36x301xf32, #tpu.memory_space<vmem>>, vector<4x288xf32>
    %c6 = arith.constant 6 : index
    %c0_38 = arith.constant 0 : index
    %61 = vector.load %arg7[%c6, %c0_38] : memref<9x288xf32, #tpu.memory_space<vmem>>, vector<1x288xf32>
    %62 = vector.broadcast %61 : vector<1x288xf32> to vector<4x288xf32>
    %63 = arith.mulf %60, %62 : vector<4x288xf32>
    %64 = arith.addf %59, %63 : vector<4x288xf32>
    %c32 = arith.constant 32 : index
    %c0_39 = arith.constant 0 : index
    %65 = vector.load %arg9[%c32, %c0_39] : memref<36x301xf32, #tpu.memory_space<vmem>>, vector<4x288xf32>
    %66 = arith.addf %64, %65 : vector<4x288xf32>
    %c0_40 = arith.constant 0 : index
    %c864 = arith.constant 864 : index
    %67 = vector.load %arg10[%c0_40, %c864] : memref<4x1152xf32, #tpu.memory_space<vmem>>, vector<4x288xf32>
    tpu.vector_store %arg10[%c0_40, %c864], %66 {strides = array<i32>} : memref<4x1152xf32, #tpu.memory_space<vmem>>, vector<4x288xf32>,
    %c0_41 = arith.constant 0 : index
    %c0_42 = arith.constant 0 : index
    %68 = vector.load %arg10[%c0_41, %c0_42] : memref<4x1152xf32, #tpu.memory_space<vmem>>, vector<4x1152xf32>
    %cst_43 = arith.constant dense<0.000000e+00> : vector<4xf32>
    %69 = vector.multi_reduction <add>, %68, %cst_43 [1] : vector<4x1152xf32> to vector<4xf32>
    %70 = vector.shape_cast %69 : vector<4xf32> to vector<4x1xf32>
    %cst_44 = arith.constant 8.68055562E-4 : f32
    %71 = vector.broadcast %cst_44 : f32 to vector<4x1xf32>
    %72 = arith.mulf %70, %71 : vector<4x1xf32>
    %73 = arith.mulf %68, %68 : vector<4x1152xf32>
    %cst_45 = arith.constant dense<0.000000e+00> : vector<4xf32>
    %74 = vector.multi_reduction <add>, %73, %cst_45 [1] : vector<4x1152xf32> to vector<4xf32>
    %75 = vector.shape_cast %74 : vector<4xf32> to vector<4x1xf32>
    %cst_46 = arith.constant 8.68055562E-4 : f32
    %76 = vector.broadcast %cst_46 : f32 to vector<4x1xf32>
    %77 = arith.mulf %75, %76 : vector<4x1xf32>
    %78 = arith.mulf %72, %72 : vector<4x1xf32>
    %79 = arith.subf %77, %78 : vector<4x1xf32>
    %80 = vector.broadcast %72 : vector<4x1xf32> to vector<4x1152xf32>
    %81 = arith.subf %68, %80 : vector<4x1152xf32>
    %cst_47 = arith.constant 9.99999974E-6 : f32
    %82 = vector.broadcast %cst_47 : f32 to vector<4x1xf32>
    %83 = arith.addf %79, %82 : vector<4x1xf32>
    %84 = math.rsqrt %83 : vector<4x1xf32>
    %85 = vector.broadcast %84 : vector<4x1xf32> to vector<4x1152xf32>
    %86 = arith.mulf %81, %85 : vector<4x1152xf32>
    %c0_48 = arith.constant 0 : index
    %c2_49 = arith.constant 2 : index
    %87 = vector.load %arg5[%c0_48, %c2_49] : memref<4x4xf32, #tpu.memory_space<vmem>>, vector<4x1xf32>
    %88 = vector.broadcast %87 : vector<4x1xf32> to vector<4x1152xf32>
    %89 = arith.mulf %86, %88 : vector<4x1152xf32>
    %c0_50 = arith.constant 0 : index
    %c3_51 = arith.constant 3 : index
    %90 = vector.load %arg5[%c0_50, %c3_51] : memref<4x4xf32, #tpu.memory_space<vmem>>, vector<4x1xf32>
    %91 = vector.broadcast %90 : vector<4x1xf32> to vector<4x1152xf32>
    %92 = arith.addf %89, %91 : vector<4x1152xf32>
    %cst_52 = arith.constant 0.000000e+00 : f32
    %93 = vector.broadcast %cst_52 : f32 to vector<4x1152xf32>
    %94 = arith.maximumf %92, %93 : vector<4x1152xf32>
    %c0_53 = arith.constant 0 : index
    %c0_54 = arith.constant 0 : index
    %95 = vector.load %arg4[%c0_53, %c0_54] : memref<8x4xbf16, #tpu.memory_space<vmem>>, vector<8x4xbf16>
    %96 = arith.truncf %94 : vector<4x1152xf32> to vector<4x1152xbf16>
    %cst_55 = arith.constant dense<0.000000e+00> : vector<8x1152xf32>
    %97 = tpu.matmul %95, %96, %cst_55 {dimension_numbers = #tpu.dot_dimension_numbers<[1], [0], [0], [1], [0, 0, 1, 1], [], []>} : vector<8x4xbf16>, vector<4x1152xbf16>, vector<8x1152xf32> -> vector<8x1152xf32>
    %cst_56 = arith.constant dense<0.000000e+00> : vector<8xf32>
    %98 = vector.multi_reduction <add>, %97, %cst_56 [1] : vector<8x1152xf32> to vector<8xf32>
    %99 = vector.shape_cast %98 : vector<8xf32> to vector<8x1xf32>
    %cst_57 = arith.constant 8.68055562E-4 : f32
    %100 = vector.broadcast %cst_57 : f32 to vector<8x1xf32>
    %101 = arith.mulf %99, %100 : vector<8x1xf32>
    %102 = arith.mulf %97, %97 : vector<8x1152xf32>
    %cst_58 = arith.constant dense<0.000000e+00> : vector<8xf32>
    %103 = vector.multi_reduction <add>, %102, %cst_58 [1] : vector<8x1152xf32> to vector<8xf32>
    %104 = vector.shape_cast %103 : vector<8xf32> to vector<8x1xf32>
    %cst_59 = arith.constant 8.68055562E-4 : f32
    %105 = vector.broadcast %cst_59 : f32 to vector<8x1xf32>
    %106 = arith.mulf %104, %105 : vector<8x1xf32>
    %107 = arith.mulf %101, %101 : vector<8x1xf32>
    %108 = arith.subf %106, %107 : vector<8x1xf32>
    %109 = vector.broadcast %101 : vector<8x1xf32> to vector<8x1152xf32>
    %110 = arith.subf %97, %109 : vector<8x1152xf32>
    %cst_60 = arith.constant 9.99999974E-6 : f32
    %111 = vector.broadcast %cst_60 : f32 to vector<8x1xf32>
    %112 = arith.addf %108, %111 : vector<8x1xf32>
    %113 = math.rsqrt %112 : vector<8x1xf32>
    %114 = vector.broadcast %113 : vector<8x1xf32> to vector<8x1152xf32>
    %115 = arith.mulf %110, %114 : vector<8x1152xf32>
    %c0_61 = arith.constant 0 : index
    %c0_62 = arith.constant 0 : index
    %116 = vector.load %arg6[%c0_61, %c0_62] : memref<8x2xf32, #tpu.memory_space<vmem>>, vector<8x1xf32>
    %117 = vector.broadcast %116 : vector<8x1xf32> to vector<8x1152xf32>
    %118 = arith.mulf %115, %117 : vector<8x1152xf32>
    %c0_63 = arith.constant 0 : index
    %c1_64 = arith.constant 1 : index
    %119 = vector.load %arg6[%c0_63, %c1_64] : memref<8x2xf32, #tpu.memory_space<vmem>>, vector<8x1xf32>
    %120 = vector.broadcast %119 : vector<8x1xf32> to vector<8x1152xf32>
    %121 = arith.addf %118, %120 : vector<8x1152xf32>
    %cst_65 = arith.constant 0.000000e+00 : f32
    %122 = vector.broadcast %cst_65 : f32 to vector<8x1152xf32>
    %123 = arith.maximumf %121, %122 : vector<8x1152xf32>
    %c0_66 = arith.constant 0 : index
    %c0_67 = arith.constant 0 : index
    %124 = vector.load %arg8[%c0_66, %c0_67] : memref<8x1152xf32, #tpu.memory_space<vmem>>, vector<8x1152xf32>
    tpu.vector_store %arg8[%c0_66, %c0_67], %123 {strides = array<i32>} : memref<8x1152xf32, #tpu.memory_space<vmem>>, vector<8x1152xf32>,
    return
  }
  func.func @transform_0(%arg0: i32) -> (i32, i32) {
    %c0_i32 = arith.constant 0 : i32
    %c0_i32_0 = arith.constant 0 : i32
    %c0_i32_1 = arith.constant 0 : i32
    return %c0_i32, %c0_i32_0 : i32, i32
  }
  func.func @transform_1(%arg0: i32) -> (i32, i32) {
    %c0_i32 = arith.constant 0 : i32
    %c0_i32_0 = arith.constant 0 : i32
    %c0_i32_1 = arith.constant 0 : i32
    return %c0_i32, %c0_i32_0 : i32, i32
  }
  func.func @transform_2(%arg0: i32) -> (i32, i32) {
    %c0_i32 = arith.constant 0 : i32
    %c0_i32_0 = arith.constant 0 : i32
    %c0_i32_1 = arith.constant 0 : i32
    return %c0_i32, %c0_i32_0 : i32, i32
  }
  func.func @transform_3(%arg0: i32) -> (i32, i32) {
    %c0_i32 = arith.constant 0 : i32
    %c0_i32_0 = arith.constant 0 : i32
    %c0_i32_1 = arith.constant 0 : i32
    return %c0_i32, %c0_i32_0 : i32, i32
  }
  func.func @transform_4(%arg0: i32) -> (i32, i32) {
    %c0_i32 = arith.constant 0 : i32
    %c0_i32_0 = arith.constant 0 : i32
    %c0_i32_1 = arith.constant 0 : i32
    return %c0_i32, %c0_i32_0 : i32, i32
  }
  func.func @transform_5(%arg0: i32) -> (i32, i32) {
    %c0_i32 = arith.constant 0 : i32
    %c0_i32_0 = arith.constant 0 : i32
    %c0_i32_1 = arith.constant 0 : i32
    return %c0_i32, %c0_i32_0 : i32, i32
  }
  func.func @transform_6(%arg0: i32) -> (i32, i32) {
    %c0_i32 = arith.constant 0 : i32
    %c0_i32_0 = arith.constant 0 : i32
    %c0_i32_1 = arith.constant 0 : i32
    return %c0_i32, %c0_i32_0 : i32, i32
  }
  func.func @transform_7(%arg0: i32) -> (i32, i32) {
    %c0_i32 = arith.constant 0 : i32
    %c0_i32_0 = arith.constant 0 : i32
    %c0_i32_1 = arith.constant 0 : i32
    return %c0_i32, %c0_i32_0 : i32, i32
  }
}

</mosaic_0001>

<bundles_post_ra>
// kernel: decoder_forward.1
= control target key start
LH: loop header
LB: loop body
LE: loop exit
PB: predicated region body
PF: predicated region fallthrough
CT: control target
= control target key end

     0   :  { %v1291_v1 = vmov 0.0   ;;  %v1292_v2 = vmov 0   ;;  %vm1293_vm0 = vmmov 0   ;;  %vm48_vm1 = vcmask 130048   ;;  %s1295_s13 = smov 12   ;;  %s1296_s16 = smov 1   ;;  %s1657_s0 = inlined_call_operand.vmem [shape: bf16[16,288], index: 0, kind: input, shape index: {}]   ;;  %s1658_s1 = inlined_call_operand.vmem [shape: bf16[4,16], index: 1, kind: input, shape index: {}]   ;;  %s1659_s4 = inlined_call_operand.vmem [shape: f32[4,4], index: 4, kind: input, shape index: {}]   ;;  %s1660_s2 = inlined_call_operand.vmem [shape: bf16[36,4], index: 2, kind: input, shape index: {}]   ;;  %s1661_s6 = inlined_call_operand.vmem [shape: f32[9,288], index: 6, kind: input, shape index: {}]   ;;  %s1662_s3 = inlined_call_operand.vmem [shape: bf16[8,4], index: 3, kind: input, shape index: {}]   ;;  %s1663_s5 = inlined_call_operand.vmem [shape: f32[8,2], index: 5, kind: input, shape index: {}]   ;;  %s1664_s7 = inlined_call_operand.vmem [shape: f32[8,1152], index: 7, kind: output, shape index: {}]  }
   0x1   :  { %v1274_v0 = vld [vmem:[%s1657_s0 + $0x4] ss:$12 sps:$4 sm:$0xff]   ;;  %1228 = vmatprep.subr.bf16.mxu1 %v1291_v1  ;;  %84 = vmatprep.mubr.bf16.mxu0 %v1292_v2  ;;  %v1276_v3 = vld [vmem:[%s1657_s0] ss:$12 sps:$4 sm:$0xff]   ;;  %v1277_v4 = vld [vmem:[%s1657_s0 + $0x8] ss:$12 sps:$4 sm:$0xff]   ;;  %v379_v29 = vlaneseq }
   0x2   :  { %1230 = vmatprep.mubr.msk.bf16.mxu1 %vm1293_vm0, %v1291_v1  ;;  %1267 = vset.pattern.permute.xlu1 %v1292_v2  ;;  %v27_v5 = vld [vmem:[%s1658_s1] sm:$0x3]  ;;  %v1294_v7 = vmov 1   ;;  %vm133_vm2 = vcmask 1043456   ;;  %vm137_vm3 = vcmask 257024   ;;  %s1297_s21 = smov 13  }
   0x3   :  { %52 = vmatprep.subr.bf16.mxu0 %v1274_v0  ;;  %1229 = vmatpush3.bf16.msra.mxu1 %v1277_v4  ;;  %v164_v6 = vld [vmem:[%s1659_s4] sm:$0xf]  ;;  %v1390_v30 = vshrl.u32 %v379_v29, 7  ;;  %v1210_v34 = vld [vmem:[%s1661_s6 + $0x6] ss:$8 sm:$0x7] }
   0x4   :  { %53 = vmatpush1.bf16.msra.mxu0 %v1276_v3  ;;  %1234 = vmatprep.subr.bf16.mxu1 %v1291_v1  ;;  %v1209_v31 = vld [vmem:[%s1661_s6 + $0x2] ss:$8 sm:$0x7]  ;;  %v1207_v38 = vld [vmem:[%s1661_s6 + $0x3] ss:$8 sm:$0x7] }
   0x5   :  { %167 = vperm.xlu1 %1267, %v164_v6   ;;  %v385_v32 = vsub.s32 1, %v1390_v30  ;;  %v381_v33 = vsub.s32 0, %v1390_v30  ;;  %v1407_v41 = vsub.s32 2, %v1390_v30  ;;  %v1208_v42 = vld [vmem:[%s1661_s6 + $0x1] ss:$8 sm:$0x7] }
   0x6   :  { %1231 = vmatmul.mubr.msk.bf16.vlgmr.msra.gmra.mrb[0].mxu1 %vm48_vm1, %v27_v5  ;;  %v1418_v45 = vld [vmem:[%s1661_s6] ss:$8 sm:$0x7]  ;;  %vm214_vm4 = vcmask 1041408   ;;  %vm204_vm5 = vcmask 31744   ;;  %vm341_vm6 = vcmask 367872  }
   0x7   :  { %1195 = vmatmul.mubr.msk.bf16.vlgmr.msra.gmra.mrb[0].mxu0 %vm48_vm1, %v27_v5  ;;  %1236 = vmatprep.mubr.msk.bf16.mxu1 %vm1293_vm0, %v1291_v1  ;;  %v565_v35 = vrot.slane %v1209_v31, %v385_v32  ;;  %v561_v36 = vrot.slane %v1209_v31, %v381_v33  ;;  %v610_v37 = vrot.slane %v1210_v34, %v381_v33  ;;  %vm346_vm7 = vcmask 363776   ;;  %s1299_s27 = smov 52   ;;  %s1300_s28 = smov 83  }
   0x8   :  { %256 = vmatprep.mubr.bf16.mxu0 %v1292_v2  ;;  %v386_v39 = vrot.slane %v1207_v38, %v385_v32  ;;  %v614_v40 = vrot.slane %v1210_v34, %v385_v32  ;;  %v460_v43 = vrot.slane %v1208_v42, %v385_v32  ;;  %v569_v44 = vrot.slane %v1209_v31, %v1407_v41 }
   0x9   :  { %1268 = vset.pattern.permute.xlu1 %v1294_v7  ;;  %v532_v46 = vrot.slane %v1418_v45, %v385_v32  ;;  %v618_v47 = vrot.slane %v1210_v34, %v1407_v41  ;;  %v382_v48 = vrot.slane %v1207_v38, %v381_v33  ;;  %v456_v49 = vrot.slane %v1208_v42, %v381_v33 }
   0xa   :  { %174 = vperm.xlu1 %1268, %v164_v6   ;;  %v528_v50 = vrot.slane %v1418_v45, %v381_v33  ;;  %v390_v51 = vrot.slane %v1207_v38, %v1407_v41  ;;  %v464_v52 = vrot.slane %v1208_v42, %v1407_v41  ;;  %342 = vst.msk [vmem:[#allocation2 + $0x10] sm:$0xff] %vm341_vm6, %v1291_v1  ;;  %343 = vst.msk [vmem:[#allocation2 + $0x28] sm:$0xff] %vm341_vm6, %v1291_v1  ;;  %vm350_vm8 = vcmask 261120  }
   0xb   :  { %344 = vst.msk [vmem:[#allocation2 + $0x40] sm:$0xff] %vm341_vm6, %v1291_v1  ;;  %345 = vst.msk [vmem:[#allocation2 + $0x58] sm:$0xff] %vm341_vm6, %v1291_v1  ;;  %vm471_vm9 = vcmask 97280   ;;  %vm397_vm10 = vcmask 7168   ;;  %vm543_vm11 = vcmask 105472   ;;  %vm441_vm12 = vcmask 1043712  }
   0xc   :  { %347 = vst.msk [vmem:[#allocation2 + $0x70] sm:$0xf] %vm346_vm7, %v1291_v1  ;;  %vm442_vm13 = vcmask 1047556   ;;  %vm436_vm14 = vcmask 252928   ;;  %vm515_vm1 = vcmask 1043968   ;;  %vm510_vm6 = vcmask 424960  }
   0xd   :  { %vm443_vm15 = vmor %vm442_vm13, %vm441_vm12 }
   0xe   :  { %572 = vrot.lane.b32.xlu1 %v565_v35, %s1295_s13  ;;  %vm516_vm7 = vmor %vm442_vm13, %vm515_vm1 }
  0x12   :  { %619 = vrot.lane.b32.xlu1 %v610_v37, %s1296_s16 }
  0x16   :  { %621 = vrot.lane.b32.xlu1 %v614_v40, %s1296_s16 }
  0x1a   :  { %574 = vrot.lane.b32.xlu1 %v569_v44, %s1295_s13 }
  0x1e   :  { %623 = vrot.lane.b32.xlu1 %v618_v47, %s1296_s16 }
  0x22   :  { %391 = vrot.lane.b32.xlu1 %v382_v48, %s1296_s16 }
  0x26   :  { %465 = vrot.lane.b32.xlu1 %v456_v49, %s1295_s13 }
  0x2a   :  { %537 = vrot.lane.b32.xlu1 %v528_v50, %s1297_s21 }
  0x2e   :  { %395 = vrot.lane.b32.xlu1 %v390_v51, %s1296_s16 }
  0x32   :  { %469 = vrot.lane.b32.xlu1 %v464_v52, %s1295_s13 }
  0x84   :  { %v168_v60 = vpop.permute.xlu1 %167 }
  0x89   :  { %v175_v6 = vpop.permute.xlu1 %174 }
  0xd9   :  { %v1373_v10 = vpop.f32.mrb[0].mxu1 }
  0xda   :  { %v1369_v8 = vpop.f32.mrb[0].mxu0  ;;  %v145_v13 = vmul.f32 %v1373_v10, %v1373_v10  ;;  %v1232_v15 = vpop.f32.mrb[1].mxu1  ;;  %v138_v18 = vsel %vm137_vm3, %v1373_v10, 0.0 }
  0xdb   :  { %v143_v9 = vmul.f32 %v1369_v8, %v1369_v8  ;;  %v1375_v11 = vpop.f32.mrb[1].mxu0  ;;  %v134_v12 = vsel %vm133_vm2, %v1369_v8, 0.0  ;;  %v130_v19 = vpop.f32.mrb[2].mxu1 }
  0xdc   :  { %v144_v14 = vmul.f32 %v1375_v11, %v1375_v11  ;;  %v90_v16 = vpop.f32.mrb[2].mxu0  ;;  %v135_v17 = vsel %vm133_vm2, %v1375_v11, 0.0  ;;  %v1233_v23 = vpop.f32.mrb[3].mxu1  ;;  %v149_v25 = vsel %vm137_vm3, %v145_v13, 0.0 }
  0xdd   :  { %v91_v20 = vpop.f32.mrb[3].mxu0  ;;  %v136_v21 = vadd.f32 %v135_v17, %v134_v12  ;;  %v146_v22 = vsel %vm133_vm2, %v143_v9, 0.0  ;;  %v1279_v23 = vld [vmem:[%s1660_s2 + $0x8] sm:$0xff]  }
  0xde   :  { %v147_v24 = vsel %vm133_vm2, %v144_v14, 0.0 }
  0xdf   :  { %v139_v26 = vadd.f32 %v138_v18, %v136_v21  ;;  %v148_v27 = vadd.f32 %v147_v24, %v146_v22  ;;  %v1278_v22 = vld [vmem:[%s1660_s2] sm:$0xff]   ;;  %v1280_v24 = vld [vmem:[%s1660_s2 + $0x10] ss:$0 sps:$4 sm:$0x33]   ;;  %s1298_s2 = smov 31  }
  0xe1   :  { %140 = vadd.xlane.f32.xlu0 %v139_v26  ;;  %v150_v28 = vadd.f32 %v149_v25, %v148_v27  ;;  %v1468_v25 = vpop.permute.xlu1 %572 }
  0xe5   :  { %151 = vadd.xlane.f32.xlu0 %v150_v28  ;;  %v620_v35 = vpop.permute.xlu1 %619 }
  0xe9   :  { %v622_v52 = vpop.permute.xlu1 %621 }
  0xfb   :  { %570 = vrot.lane.b32.xlu0 %v561_v36, %s1295_s13 }
  0xff   :  { %393 = vrot.lane.b32.xlu0 %v386_v39, %s1296_s16 }
 0x103   :  { %467 = vrot.lane.b32.xlu0 %v460_v43, %s1295_s13 }
 0x107   :  { %539 = vrot.lane.b32.xlu0 %v532_v46, %s1297_s21 }
 0x16e   :  { %v141_v53 = vpop.xlane.xlu0 %140 }
 0x16f   :  { %v142_v54 = vmul.f32 0.0034722222, %v141_v53 }
 0x171   :  { %v154_v56 = vmul.f32 %v142_v54, %v142_v54  ;;  %v156_v61 = vsub.f32 %v1369_v8, %v142_v54  ;;  %v157_v62 = vsub.f32 %v1375_v11, %v142_v54  ;;  %v158_v63 = vsub.f32 %v1373_v10, %v142_v54 }
 0x172   :  { %v152_v55 = vpop.xlane.xlu0 %151 }
 0x173   :  { %v153_v57 = vmul.f32 0.0034722222, %v152_v55 }
 0x175   :  { %v155_v58 = vsub.f32 %v153_v57, %v154_v56 }
 0x176   :  { %v571_v36 = vpop.permute.xlu0 %570 }
 0x177   :  { %v159_v59 = vadd.f32 1e-05, %v155_v58  ;;  %v576_v39 = vsel %vm471_vm9, %v571_v36, %v1468_v25 }
 0x179   :  { %1284 = vrsqrt.f32 %v159_v59 }
 0x183   :  { %v1285_v0 = vpop.eup %1284 }
 0x184   :  { %v161_v3 = vmul.f32 %v1285_v0, %v156_v61  ;;  %v162_v4 = vmul.f32 %v1285_v0, %v157_v62  ;;  %v163_v5 = vmul.f32 %v1285_v0, %v158_v63 }
 0x186   :  { %v170_v9 = vmul.f32 %v168_v60, %v161_v3  ;;  %v171_v12 = vmul.f32 %v168_v60, %v162_v4  ;;  %v172_v13 = vmul.f32 %v168_v60, %v163_v5 }
 0x188   :  { %v177_v14 = vadd.f32 %v175_v6, %v170_v9  ;;  %v178_v15 = vadd.f32 %v175_v6, %v171_v12  ;;  %v179_v16 = vadd.f32 %v175_v6, %v172_v13 }
 0x18a   :  { %v180_v17 = vmax.f32 %v177_v14, 0.0  ;;  %v181_v18 = vmax.f32 %v178_v15, 0.0  ;;  %v182_v19 = vmax.f32 %v179_v16, 0.0  ;;  %v575_v14 = vpop.permute.xlu1 %574  ;;  %v625_v16 = vsel %vm397_vm10, %v620_v35, %v622_v52 }
 0x18c   :  { %v188_v8 = vpack.c.bf16 %v180_v17, %v180_v17  ;;  %v189_v20 = vpack.c.bf16 %v181_v18, %v181_v18  ;;  %v190_v11 = vpack.c.bf16 %v182_v19, %v182_v19  ;;  %v536_v19 = vrot.slane %v1418_v45, %v1407_v41 }
 0x18e   :  { %1200 = vmatprep.subr.msk.bf16.mxu0 %vm214_vm4, %v189_v20  ;;  %v216_v10 = vsel %vm214_vm4, %v188_v8, 0  ;;  %v222_v21 = vsel %vm214_vm4, %v190_v11, 0  ;;  %v624_v20 = vpop.permute.xlu1 %623 }
 0x18f   :  { %225 = vmatpush1.bf16.msra.mxu0 %v216_v10  ;;  %1235 = vmatpush3.bf16.msra.mxu1 %v222_v21  ;;  %v626_v11 = vsel %vm397_vm10, %v622_v52, %v624_v20  ;;  %v577_v21 = vsel %vm471_vm9, %v1468_v25, %v575_v14 }
 0x192   :  { %1201 = vmatmul.mubr.msk.bf16.vlgmr.msra.gmra.mrb[4].mxu0 %vm204_vm5, %v1278_v22  ;;  %1237 = vmatmul.mubr.msk.bf16.vlgmr.msra.gmra.mrb[4].mxu1 %vm204_vm5, %v1278_v22 }
 0x193   :  { %266 = vmatprep.mubr.bf16.mxu0 %v1292_v2  ;;  %1240 = vmatprep.mubr.msk.bf16.mxu1 %vm1293_vm0, %v1291_v1 }
 0x19a   :  { %1202 = vmatmul.mubr.msk.bf16.gmra.mrb[8].mxu0 %vm204_vm5, %v1279_v23  ;;  %1241 = vmatmul.mubr.msk.bf16.gmra.mrb[8].mxu1 %vm204_vm5, %v1279_v23 }
 0x19b   :  { %276 = vmatprep.mubr.bf16.mxu0 %v1292_v2  ;;  %1244 = vmatprep.mubr.msk.bf16.mxu1 %vm1293_vm0, %v1291_v1 }
 0x1a2   :  { %1203 = vmatmul.mubr.msk.bf16.gmra.mrb[12].mxu0 %vm204_vm5, %v1280_v24  ;;  %1245 = vmatmul.mubr.msk.bf16.gmra.mrb[12].mxu1 %vm204_vm5, %v1280_v24 }
 0x1a3   :  { %917 = vmatprep.mubr.bf16.mxu0 %v1292_v2  ;;  %958 = vmatprep.mubr.bf16.mxu1 %v1292_v2 }
 0x265   :  { %v319_v26 = vpop.f32.mrb[4].mxu1  ;;  %v258_v27 = vpop.f32.mrb[4].mxu0 }
 0x266   :  { %351 = vst.msk [vmem:[#allocation2 + $0x10] sm:$0xff] %vm350_vm8, %v319_v26  ;;  %348 = vst [vmem:[#allocation2] sm:$0xff] %v258_v27  ;;  %v260_v28 = vpop.f32.mrb[5].mxu0  ;;  %v1238_v29 = vpop.f32.mrb[5].mxu1 }
 0x267   :  { %349 = vst [vmem:[#allocation2 + $0x8] sm:$0xff] %v260_v28  ;;  %v262_v31 = vpop.f32.mrb[6].mxu0  ;;  %v322_v32 = vpop.f32.mrb[6].mxu1 }
 0x268   :  { %352 = vst [vmem:[#allocation2 + $0x18] sm:$0xff] %v262_v31  ;;  %354 = vst.msk [vmem:[#allocation2 + $0x28] sm:$0xff] %vm350_vm8, %v322_v32  ;;  %v264_v33 = vpop.f32.mrb[7].mxu0  ;;  %v1239_v34 = vpop.f32.mrb[7].mxu1 }
 0x269   :  { %353 = vst [vmem:[#allocation2 + $0x20] sm:$0xff] %v264_v33  ;;  %v392_v26 = vpop.permute.xlu1 %391  ;;  %v394_v28 = vpop.permute.xlu0 %393 }
 0x26d   :  { %v327_v37 = vpop.f32.mrb[8].mxu1  ;;  %v268_v38 = vpop.f32.mrb[8].mxu0 }
 0x26e   :  { %357 = vst.msk [vmem:[#allocation2 + $0x40] sm:$0xff] %vm350_vm8, %v327_v37  ;;  %355 = vst [vmem:[#allocation2 + $0x30] sm:$0xff] %v268_v38  ;;  %v270_v40 = vpop.f32.mrb[9].mxu0  ;;  %v1242_v42 = vpop.f32.mrb[9].mxu1  ;;  %v398_v37 = vsel %vm397_vm10, %v392_v26, %v394_v28 }
 0x26f   :  { %356 = vst [vmem:[#allocation2 + $0x38] sm:$0xff] %v270_v40  ;;  %v272_v43 = vpop.f32.mrb[10].mxu0  ;;  %v330_v44 = vpop.f32.mrb[10].mxu1  ;;  %v552_v46 = vld [vmem:[#allocation2 + $0x18] sm:$0xf] }
 0x270   :  { %358 = vst [vmem:[#allocation2 + $0x48] sm:$0xff] %v272_v43  ;;  %360 = vst.msk [vmem:[#allocation2 + $0x58] sm:$0xff] %vm350_vm8, %v330_v44  ;;  %v274_v47 = vpop.f32.mrb[11].mxu0  ;;  %v1243_v48 = vpop.f32.mrb[11].mxu1  ;;  %v581_v49 = vmul.f32 %v571_v36, %v552_v46  ;;  %v553_v50 = vld [vmem:[#allocation2 + $0x20] sm:$0xf] }
 0x271   :  { %359 = vst [vmem:[#allocation2 + $0x50] sm:$0xff] %v274_v47  ;;  %v582_v51 = vmul.f32 %v576_v39, %v553_v50  ;;  %v554_v24 = vld [vmem:[#allocation2 + $0x28] sm:$0xf]  ;;  %v466_v27 = vpop.permute.xlu1 %465  ;;  %v468_v31 = vpop.permute.xlu0 %467  ;;  %v373_v38 = vld [vmem:[#allocation2 + $0x18] sm:$0xf0]  ;;  %vm518_vm8 = vcmask 781312  }
 0x272   :  { %587 = vrot.lane.b32.xlu0 %v581_v49, %s1296_s16  ;;  %v583_v41 = vmul.f32 %v577_v21, %v554_v24  ;;  %v374_v40 = vld [vmem:[#allocation2 + $0x20] sm:$0xf0]  ;;  %v375_v42 = vld [vmem:[#allocation2 + $0x28] sm:$0xf0]  ;;  %v403_v44 = vmul.f32 %v392_v26, %v373_v38  ;;  %v472_v50 = vsel %vm471_vm9, %v466_v27, %v468_v31 }
 0x273   :  { %589 = vrot.lane.b32.xlu1 %v582_v51, %s1296_s16  ;;  %v404_v46 = vmul.f32 %v398_v37, %v374_v40  ;;  %v447_v48 = vld [vmem:[#allocation2] sm:$0xf0]  ;;  %v448_v49 = vld [vmem:[#allocation2 + $0x8] sm:$0xf0]  ;;  %v522_v37 = vld [vmem:[#allocation2 + $0x10] sm:$0xf] }
 0x275   :  { %v364_v53 = vld [vmem:[#allocation2 + $0x30] sm:$0xf]  ;;  %v408_v54 = vld [vmem:[#allocation2 + $0x40] sm:$0xf0]  ;;  %v406_v55 = vld [vmem:[#allocation2 + $0x30] sm:$0xf0]  ;;  %v538_v29 = vpop.permute.xlu1 %537  ;;  %v1505_v25 = vpop.permute.xlu0 %539 }
 0x276   :  { %v1478_v56 = vld [vmem:[#allocation2 + $0x38] sm:$0xf]  ;;  %416 = vrot.lane.b32.xlu0 %v408_v54, %s1296_s16  ;;  %v278_v57 = vpop.f32.mrb[12].mxu0  ;;  %v335_v58 = vpop.f32.mrb[12].mxu1  ;;  %v407_v60 = vld [vmem:[#allocation2 + $0x38] sm:$0xf0] }
 0x277   :  { %v1482_v59 = vcombine.low %v364_v53, %v1478_v56  ;;  %412 = vrot.lane.b32.xlu1 %v406_v55, %s1296_s16  ;;  %361 = vst [vmem:[#allocation2 + $0x60] sm:$0xf] %v278_v57  ;;  %v280_v61 = vpop.f32.mrb[13].mxu0  ;;  %363 = vst.msk [vmem:[#allocation2 + $0x70] sm:$0xf] %vm137_vm3, %v335_v58  ;;  %v1246_v62 = vpop.f32.mrb[13].mxu1  ;;  %v477_v58 = vmul.f32 %v466_v27, %v447_v48 }
 0x278   :  { %362 = vst [vmem:[#allocation2 + $0x68] sm:$0xf] %v280_v61  ;;  %v282_v63 = vpop.f32.mrb[14].mxu0  ;;  %v338_v0 = vpop.f32.mrb[14].mxu1  ;;  %v481_v5 = vld [vmem:[#allocation2 + $0x50] sm:$0xf0] }
 0x279   :  { %v283_v3 = vpop.f32.mrb[15].mxu0  ;;  %v1247_v4 = vpop.f32.mrb[15].mxu1  ;;  %v601_v6 = vld [vmem:[#allocation2 + $0x48] sm:$0xf]  ;;  %v366_v9 = vld [vmem:[#allocation2 + $0x40] sm:$0xf] }
 0x27a   :  { %414 = vrot.lane.b32.xlu0 %v407_v60, %s1296_s16  ;;  %372 = vst.msk [vmem:[#allocation3 + $0x8] sm:$0xf] %vm137_vm3, %v366_v9  ;;  %v480_v12 = vld [vmem:[#allocation2 + $0x48] sm:$0xf0]  ;;  %v630_v13 = vmul.f32 %v620_v35, %v601_v6  ;;  %v482_v17 = vld [vmem:[#allocation2 + $0x58] sm:$0xf0]  ;;  %v396_v32 = vpop.permute.xlu1 %395  ;;  %v478_v60 = vmul.f32 %v472_v50, %v448_v49 }
 0x27b   :  { %488 = vrot.lane.b32.xlu1 %v481_v5, %s1295_s13  ;;  %v602_v18 = vld [vmem:[#allocation2 + $0x50] sm:$0xf]  ;;  %v603_v10 = vld [vmem:[#allocation2 + $0x58] sm:$0xf]  ;;  %v399_v43 = vsel %vm397_vm10, %v394_v28, %v396_v32  ;;  %v449_v0 = vld [vmem:[#allocation2 + $0x10] sm:$0xf0] }
 0x27c   :  { %v631_v8 = vmul.f32 %v625_v16, %v602_v18  ;;  %v632_v23 = vmul.f32 %v626_v11, %v603_v10  ;;  %v405_v54 = vmul.f32 %v399_v43, %v375_v42  ;;  %v544_v18 = vsel %vm543_vm11, %v538_v29, %v1505_v25 }
 0x27d   :  { %v1301_v49 = vmov 2   ;;  %v1302_v50 = vmov 3   ;;  %vm445_vm3 = vcmask 519168  }
 0x27e   :  { %486 = vrot.lane.b32.xlu0 %v480_v12, %s1295_s13  ;;  %v650_v22 = vld [vmem:[#allocation2 + $0x60] sm:$0xf]  ;;  %v652_v45 = vld [vmem:[#allocation2 + $0x70] sm:$0xf]  ;;  %v470_v33 = vpop.permute.xlu1 %469  ;;  %1270 = vset.pattern.permute.xlu1 %v1302_v50 }
 0x27f   :  { %636 = vrot.lane.b32.xlu1 %v630_v13, %s1295_s13  ;;  %v651_v15 = vld [vmem:[#allocation2 + $0x68] sm:$0xf]  ;;  %v473_v3 = vsel %vm471_vm9, %v468_v31, %v470_v33  ;;  %v520_v13 = vld [vmem:[#allocation2] sm:$0xf]  ;;  %1269 = vset.pattern.permute.xlu0 %v1301_v49 }
 0x280   :  { %v479_v12 = vmul.f32 %v473_v3, %v449_v0  ;;  %v549_v11 = vmul.f32 %v538_v29, %v520_v13  ;;  %v705_v3 = vsel %vm133_vm2, %v1482_v59, 0.0 }
 0x282   :  { %490 = vrot.lane.b32.xlu0 %v482_v17, %s1295_s13  ;;  %v521_v17 = vld [vmem:[#allocation2 + $0x8] sm:$0xf] }
 0x283   :  { %658 = vrot.lane.b32.xlu1 %v651_v15, %s1297_s21  ;;  %v550_v21 = vmul.f32 %v544_v18, %v521_v17 }
 0x286   :  { %638 = vrot.lane.b32.xlu0 %v631_v8, %s1295_s13 }
 0x287   :  { %541 = vrot.lane.b32.xlu1 %v536_v19, %s1297_s21 }
 0x28a   :  { %656 = vrot.lane.b32.xlu0 %v650_v22, %s1297_s21 }
 0x28b   :  { %640 = vrot.lane.b32.xlu1 %v632_v23, %s1295_s13 }
 0x28e   :  { %591 = vrot.lane.b32.xlu0 %v583_v41, %s1296_s16 }
 0x292   :  { %660 = vrot.lane.b32.xlu0 %v652_v45, %s1297_s21 }
 0x2e4   :  { %v588_v34 = vpop.permute.xlu0 %587 }
 0x2e5   :  { %v1507_v35 = vpop.permute.xlu1 %589  ;;  %v598_v24 = vadd.f32 %v588_v34, %v549_v11 }
 0x2e6   :  { %v593_v10 = vsel %vm397_vm10, %v588_v34, %v1507_v35 }
 0x2e7   :  { %v599_v45 = vadd.f32 %v593_v10, %v550_v21 }
 0x2e8   :  { %v417_v36 = vpop.permute.xlu0 %416 }
 0x2e9   :  { %v413_v39 = vpop.permute.xlu1 %412 }
 0x2ea   :  { %v423_v55 = vadd.f32 %v413_v39, %v403_v44 }
 0x2ec   :  { %v415_v47 = vpop.permute.xlu0 %414 }
 0x2ed   :  { %v418_v51 = vsel %vm397_vm10, %v413_v39, %v415_v47  ;;  %v419_v52 = vsel %vm397_vm10, %v415_v47, %v417_v36  ;;  %v489_v53 = vpop.permute.xlu1 %488 }
 0x2ee   :  { %v424_v57 = vadd.f32 %v418_v51, %v404_v46  ;;  %v425_v61 = vadd.f32 %v419_v52, %v405_v54 }
 0x2f0   :  { %v487_v62 = vpop.permute.xlu0 %486  ;;  %v429_v63 = vcombine.high %v423_v55, %v424_v57  ;;  %v430_v14 = vcombine.high %v425_v61, %v425_v61  ;;  %v725_v55 = vmul.f32 %v1482_v59, %v1482_v59 }
 0x2f1   :  { %v492_v4 = vsel %vm471_vm9, %v487_v62, %v489_v53  ;;  %v497_v5 = vadd.f32 %v487_v62, %v477_v58  ;;  %v637_v6 = vpop.permute.xlu1 %636 }
 0x2f2   :  { %v498_v9 = vadd.f32 %v492_v4, %v478_v60  ;;  %431 = vrot.lane.b32.xlu1 %v429_v63, %s1298_s2  ;;  %v647_v27 = vadd.f32 %v637_v6, %v598_v24  ;;  %v1290_v60 = vcombine.low %v1478_v56, %v1478_v56  ;;  %v734_v63 = vcombine.high %v725_v55, %v725_v55 }
 0x2f4   :  { %v503_v15 = vcombine.high %v497_v5, %v498_v9  ;;  %v491_v16 = vpop.permute.xlu0 %490  ;;  %v706_v4 = vsel %vm133_vm2, %v1290_v60, 0.0  ;;  %v743_v13 = vsel %vm133_vm2, %v734_v63, 0.0 }
 0x2f5   :  { %v493_v19 = vsel %vm471_vm9, %v489_v53, %v491_v16  ;;  %v659_v8 = vpop.permute.xlu1 %658 }
 0x2f6   :  { %v499_v20 = vadd.f32 %v493_v19, %v479_v12  ;;  %505 = vrot.lane.b32.xlu0 %v503_v15, %s1299_s27  ;;  %433 = vrot.lane.b32.xlu1 %v430_v14, %s1298_s2  ;;  %v707_v14 = vadd.f32 %v706_v4, %v705_v3  ;;  %v1303_v3 = vmov 839922192  }
 0x2f7   :  { %v766_v4 = vunpack.c.l.s4 %v1303_v3 }
 0x2f8   :  { %v504_v22 = vcombine.high %v499_v20, %v499_v20  ;;  %v639_v23 = vpop.permute.xlu0 %638 }
 0x2f9   :  { %v642_v41 = vsel %vm471_vm9, %v637_v6, %v639_v23  ;;  %v542_v26 = vpop.permute.xlu1 %541  ;;  %v742_v6 = vsel %vm133_vm2, %v725_v55, 0.0 }
 0x2fa   :  { %507 = vrot.lane.b32.xlu1 %v504_v22, %s1299_s27  ;;  %v648_v28 = vadd.f32 %v642_v41, %v599_v45  ;;  %v545_v32 = vsel %vm543_vm11, %v1505_v25, %v542_v26  ;;  %v744_v19 = vadd.f32 %v743_v13, %v742_v6 }
 0x2fb   :  { %v551_v38 = vmul.f32 %v545_v32, %v522_v37 }
 0x2fc   :  { %v657_v31 = vpop.permute.xlu0 %656 }
 0x2fd   :  { %v662_v29 = vsel %vm543_vm11, %v657_v31, %v659_v8  ;;  %v667_v33 = vadd.f32 %v657_v31, %v647_v27  ;;  %v641_v40 = vpop.permute.xlu1 %640 }
 0x2fe   :  { %v668_v36 = vadd.f32 %v662_v29, %v648_v28  ;;  %v643_v44 = vsel %vm471_vm9, %v639_v23, %v641_v40  ;;  %vm684_vm9 = vcmask 1044224  }
 0x300   :  { %v673_v39 = vcombine.low %v667_v33, %v668_v36  ;;  %v592_v34 = vpop.permute.xlu0 %591 }
 0x301   :  { %v594_v42 = vsel %vm397_vm10, %v1507_v35, %v592_v34  ;;  %vm679_vm10 = vcmask 678912  }
 0x302   :  { %v600_v43 = vadd.f32 %v594_v42, %v551_v38  ;;  %674 = vrot.lane.b32.xlu0 %v673_v39, %s1300_s28 }
 0x304   :  { %v661_v46 = vpop.permute.xlu0 %660  ;;  %v649_v47 = vadd.f32 %v643_v44, %v600_v43 }
 0x305   :  { %v663_v25 = vsel %vm543_vm11, %v659_v8, %v661_v46  ;;  %vm685_vm11 = vmor %vm442_vm13, %vm684_vm9 }
 0x306   :  { %v669_v48 = vadd.f32 %v663_v25, %v649_v47 }
 0x308   :  { %676 = vrot.lane.b32.xlu0 %v669_v48, %s1300_s28 }
 0x364   :  { %v432_v51 = vpop.permute.xlu1 %431 }
 0x365   :  { %v435_v35 = vrot.slane %v432_v51, 4 }
 0x367   :  { %v437_v52 = vsel %vm436_vm14, %v435_v35, %v432_v51 }
 0x368   :  { %444 = vst.msk [vmem:[#allocation3 + $0x8] sm:$0xff] %vm443_vm15, %v437_v52  ;;  %v506_v53 = vpop.permute.xlu0 %505  ;;  %v434_v54 = vpop.permute.xlu1 %433 }
 0x369   :  { %v509_v57 = vrot.slane %v506_v53, 4  ;;  %v438_v58 = vsel %vm436_vm14, %v435_v35, %v434_v54 }
 0x36a   :  { %446 = vst.msk [vmem:[#allocation3 + $0x10] sm:$0xf] %vm445_vm3, %v438_v58  ;;  %v794_v58 = vld [vmem:[%s1659_s4] sm:$0xf] }
 0x36b   :  { %v511_v61 = vsel %vm510_vm6, %v509_v57, %v506_v53 }
 0x36c   :  { %517 = vst.msk [vmem:[#allocation3 + $0x10] sm:$0xff] %vm516_vm7, %v511_v61  ;;  %v508_v62 = vpop.permute.xlu1 %507 }
 0x36d   :  { %v512_v0 = vsel %vm510_vm6, %v509_v57, %v508_v62 }
 0x36e   :  { %519 = vst.msk [vmem:[#allocation3 + $0x18] sm:$0xf] %vm518_vm8, %v512_v0 }
 0x36f   :  { %v1538_v5 = vld [vmem:[#allocation3 + $0x8] sm:$0xff] }
 0x370   :  { %v698_v9 = vcombine.high %v1538_v5, %v1538_v5  ;;  %v708_v56 = vsel %vm133_vm2, %v1538_v5, 0.0  ;;  %v726_v12 = vmul.f32 %v1538_v5, %v1538_v5 }
 0x371   :  { %v709_v18 = vadd.f32 %v708_v56, %v707_v14 }
 0x372   :  { %v735_v15 = vcombine.high %v726_v12, %v726_v12  ;;  %v745_v16 = vsel %vm133_vm2, %v726_v12, 0.0  ;;  %v710_v20 = vsel %vm133_vm2, %v698_v9, 0.0  ;;  %v767_v9 = vunpack.c.0.s8 %v766_v4 }
 0x373   :  { %v1549_v17 = vld [vmem:[#allocation3 + $0x10] sm:$0xff]  ;;  %v746_v10 = vadd.f32 %v745_v16, %v744_v19  ;;  %v711_v24 = vadd.f32 %v710_v20, %v709_v18 }
 0x374   :  { %v675_v8 = vpop.permute.xlu0 %674  ;;  %v727_v21 = vmul.f32 %v1549_v17, %v1549_v17  ;;  %v747_v22 = vsel %vm133_vm2, %v735_v15, 0.0  ;;  %v699_v41 = vcombine.high %v1549_v17, %v1549_v17  ;;  %v712_v45 = vsel %vm133_vm2, %v1549_v17, 0.0 }
 0x375   :  { %v678_v11 = vrot.slane %v675_v8, 4  ;;  %v748_v26 = vadd.f32 %v747_v22, %v746_v10  ;;  %v713_v29 = vadd.f32 %v712_v45, %v711_v24  ;;  %v770_v12 = vsub.s32 %v767_v9, %v1390_v30 }
 0x376   :  { %v736_v28 = vcombine.high %v727_v21, %v727_v21  ;;  %v749_v31 = vsel %vm133_vm2, %v727_v21, 0.0  ;;  %v714_v33 = vsel %vm133_vm2, %v699_v41, 0.0 }
 0x377   :  { %v680_v23 = vsel %vm679_vm10, %v678_v11, %v675_v8  ;;  %v750_v36 = vadd.f32 %v749_v31, %v748_v26  ;;  %v715_v39 = vadd.f32 %v714_v33, %v713_v29 }
 0x378   :  { %686 = vst.msk [vmem:[#allocation3 + $0x18] sm:$0xff] %vm685_vm11, %v680_v23  ;;  %v751_v37 = vsel %vm133_vm2, %v736_v28, 0.0 }
 0x379   :  { %v752_v44 = vadd.f32 %v751_v37, %v750_v36 }
 0x37a   :  { %v677_v27 = vpop.permute.xlu0 %676 }
 0x37b   :  { %v681_v32 = vsel %vm679_vm10, %v678_v11, %v677_v27 }
 0x37c   :  { %687 = vst [vmem:[#allocation3 + $0x20] sm:$0xf] %v681_v32 }
 0x37f   :  { %v691_v38 = vld [vmem:[#allocation3 + $0x18] sm:$0xff] }
 0x380   :  { %v700_v40 = vcombine.high %v691_v38, %v691_v38  ;;  %v716_v34 = vsel %vm133_vm2, %v691_v38, 0.0  ;;  %v728_v42 = vmul.f32 %v691_v38, %v691_v38 }
 0x381   :  { %v717_v43 = vadd.f32 %v716_v34, %v715_v39 }
 0x382   :  { %v718_v46 = vsel %vm133_vm2, %v700_v40, 0.0  ;;  %v737_v47 = vcombine.high %v728_v42, %v728_v42  ;;  %v753_v25 = vsel %vm133_vm2, %v728_v42, 0.0 }
 0x383   :  { %v692_v48 = vld [vmem:[#allocation3 + $0x20] sm:$0xf]  ;;  %v719_v49 = vadd.f32 %v718_v46, %v717_v43  ;;  %v754_v50 = vadd.f32 %v753_v25, %v752_v44 }
 0x384   :  { %v720_v51 = vsel %vm133_vm2, %v692_v48, 0.0  ;;  %v729_v35 = vmul.f32 %v692_v48, %v692_v48  ;;  %v755_v52 = vsel %vm133_vm2, %v737_v47, 0.0 }
 0x385   :  { %v721_v53 = vadd.f32 %v720_v51, %v719_v49  ;;  %v756_v54 = vadd.f32 %v755_v52, %v754_v50 }
 0x386   :  { %v757_v55 = vsel %vm133_vm2, %v729_v35, 0.0 }
 0x387   :  { %722 = vadd.xlane.f32.xlu1 %v721_v53  ;;  %v758_v57 = vadd.f32 %v757_v55, %v756_v54  ;;  %v833_v53 = vld [vmem:[%s1662_s3] sm:$0xf] }
 0x389   :  { %759 = vadd.xlane.f32.xlu0 %v758_v57 }
 0x398   :  { %813 = vperm.xlu1 %1270, %v794_v58  }
 0x39c   :  { %1271 = vset.pattern.permute.xlu1 %v1292_v2 }
 0x39f   :  { %797 = vperm.xlu0 %1269, %v794_v58  }
 0x3a3   :  { %1273 = vset.pattern.permute.xlu0 %v1294_v7 }
 0x414   :  { %v723_v60 = vpop.xlane.xlu1 %722 }
 0x415   :  { %v724_v61 = vmul.f32 0.00086805556, %v723_v60 }
 0x416   :  { %v760_v62 = vpop.xlane.xlu0 %759 }
 0x417   :  { %v762_v63 = vmul.f32 %v724_v61, %v724_v61  ;;  %v761_v0 = vmul.f32 0.00086805556, %v760_v62  ;;  %v771_v13 = vrot.slane %v724_v61, %v770_v12 }
 0x418   :  { %v814_v15 = vpop.permute.xlu1 %813 }
 0x419   :  { %v763_v6 = vsub.f32 %v761_v0, %v762_v63  ;;  %v773_v18 = vsub.f32 %v1482_v59, %v771_v13  ;;  %v774_v19 = vsub.f32 %v1538_v5, %v771_v13  ;;  %v775_v8 = vsub.f32 %v1549_v17, %v771_v13 }
 0x41a   :  { %v776_v20 = vsub.f32 %v691_v38, %v771_v13  ;;  %v821_v21 = vrot.slane %v814_v15, %v770_v12  ;;  %v777_v45 = vsub.f32 %v692_v48, %v771_v13 }
 0x41b   :  { %v778_v56 = vadd.f32 1e-05, %v763_v6 }
 0x41d   :  { %1286 = vrsqrt.f32 %v778_v56 }
 0x41e   :  { %v798_v14 = vpop.permute.xlu0 %797 }
 0x41f   :  { %v805_v10 = vrot.slane %v798_v14, %v770_v12 }
 0x427   :  { %v1287_v16 = vpop.eup %1286 }
 0x428   :  { %v787_v11 = vrot.slane %v1287_v16, %v770_v12 }
 0x42a   :  { %v789_v22 = vmul.f32 %v787_v11, %v773_v18  ;;  %v790_v23 = vmul.f32 %v787_v11, %v774_v19  ;;  %v791_v24 = vmul.f32 %v787_v11, %v775_v8  ;;  %v792_v41 = vmul.f32 %v787_v11, %v776_v20 }
 0x42b   :  { %v793_v31 = vmul.f32 %v787_v11, %v777_v45 }
 0x42c   :  { %v807_v30 = vmul.f32 %v805_v10, %v789_v22  ;;  %v808_v26 = vmul.f32 %v805_v10, %v790_v23  ;;  %v809_v27 = vmul.f32 %v805_v10, %v791_v24  ;;  %v810_v28 = vmul.f32 %v805_v10, %v792_v41 }
 0x42d   :  { %v811_v38 = vmul.f32 %v805_v10, %v793_v31 }
 0x42e   :  { %v823_v32 = vadd.f32 %v821_v21, %v807_v30  ;;  %v824_v59 = vadd.f32 %v821_v21, %v808_v26  ;;  %v825_v29 = vadd.f32 %v821_v21, %v809_v27  ;;  %v826_v5 = vadd.f32 %v821_v21, %v810_v28 }
 0x42f   :  { %v827_v49 = vadd.f32 %v821_v21, %v811_v38 }
 0x430   :  { %v828_v33 = vmax.f32 %v823_v32, 0.0  ;;  %v829_v17 = vmax.f32 %v824_v59, 0.0  ;;  %v830_v36 = vmax.f32 %v825_v29, 0.0  ;;  %v831_v37 = vmax.f32 %v826_v5, 0.0 }
 0x431   :  { %v832_v57 = vmax.f32 %v827_v49, 0.0 }
 0x432   :  { %v838_v39 = vcombine.high %v828_v33, %v828_v33  ;;  %v839_v40 = vcombine.high %v829_v17, %v829_v17  ;;  %v846_v34 = vpack.c.bf16 %v828_v33, %v828_v33  ;;  %v848_v42 = vpack.c.bf16 %v829_v17, %v829_v17 }
 0x433   :  { %v840_v43 = vcombine.high %v830_v36, %v830_v36  ;;  %v841_v44 = vcombine.high %v831_v37, %v831_v37  ;;  %v850_v25 = vpack.c.bf16 %v830_v36, %v830_v36  ;;  %v852_v48 = vpack.c.bf16 %v831_v37, %v831_v37 }
 0x434   :  { %v847_v46 = vpack.c.bf16 %v838_v39, %v838_v39  ;;  %v849_v47 = vpack.c.bf16 %v839_v40, %v839_v40  ;;  %v859_v50 = vsel %vm214_vm4, %v846_v34, 0  ;;  %v865_v51 = vsel %vm214_vm4, %v848_v42, 0  ;;  %v1142_v42 = vld [vmem:[%s1663_s5] sm:$0xff] }
 0x435   :  { %v851_v35 = vpack.c.bf16 %v840_v43, %v840_v43  ;;  %v853_v52 = vpack.c.bf16 %v841_v44, %v841_v44  ;;  %v871_v54 = vsel %vm214_vm4, %v850_v25, 0  ;;  %v877_v55 = vsel %vm214_vm4, %v852_v48, 0 }
 0x436   :  { %1211 = vmatprep.subr.msk.bf16.mxu0 %vm214_vm4, %v847_v46  ;;  %1213 = vmatprep.subr.msk.bf16.mxu1 %vm214_vm4, %v849_v47  ;;  %v854_v58 = vpack.c.bf16 %v832_v57, %v832_v57 }
 0x437   :  { %886 = vmatpush1.bf16.msra.mxu0 %v859_v50  ;;  %927 = vmatpush1.bf16.msra.mxu1 %v865_v51 }
 0x438   :  { %1215 = vmatprep.subr.msk.bf16.mxu0 %vm214_vm4, %v851_v35  ;;  %1217 = vmatprep.subr.msk.bf16.mxu1 %vm214_vm4, %v853_v52  ;;  %v883_v60 = vsel %vm214_vm4, %v854_v58, 0 }
 0x43a   :  { %1212 = vmatmul.mubr.msk.bf16.vlgmr.msra.gmra.mrb[16].mxu0 %vm204_vm5, %v833_v53  ;;  %1214 = vmatmul.mubr.msk.bf16.vlgmr.msra.gmra.mrb[16].mxu1 %vm204_vm5, %v833_v53 }
 0x43b   :  { %968 = vmatpush1.bf16.msra.mxu0 %v871_v54  ;;  %1009 = vmatpush1.bf16.msra.mxu1 %v877_v55 }
 0x43c   :  { %999 = vmatprep.mubr.bf16.mxu0 %v1292_v2  ;;  %1248 = vmatprep.subr.bf16.mxu0 %v1291_v1 }
 0x43d   :  { %1040 = vmatprep.mubr.bf16.mxu1 %v1292_v2 }
 0x442   :  { %1216 = vmatmul.mubr.msk.bf16.vlgmr.msra.gmra.mrb[20].mxu0 %vm204_vm5, %v833_v53  ;;  %1218 = vmatmul.mubr.msk.bf16.vlgmr.msra.gmra.mrb[20].mxu1 %vm204_vm5, %v833_v53 }
 0x443   :  { %1249 = vmatpush3.bf16.msra.mxu0 %v883_v60  ;;  %1250 = vmatprep.mubr.msk.bf16.mxu0 %vm1293_vm0, %v1291_v1 }
 0x44a   :  { %1251 = vmatmul.mubr.msk.bf16.vlgmr.msra.gmra.mrb[24].mxu0 %vm204_vm5, %v833_v53 }
 0x50d   :  { %v1602_v61 = vpop.f32.mrb[16].mxu0  ;;  %v1604_v62 = vpop.f32.mrb[16].mxu1 }
 0x50e   :  { %v1100_v2 = vmul.f32 %v1602_v61, %v1602_v61  ;;  %v1608_v63 = vpop.f32.mrb[17].mxu0  ;;  %v1610_v0 = vpop.f32.mrb[17].mxu1  ;;  %v1102_v1 = vmul.f32 %v1604_v62, %v1604_v62 }
 0x50f   :  { %v1089_v3 = vadd.f32 %v1608_v63, %v1602_v61  ;;  %v1101_v4 = vmul.f32 %v1608_v63, %v1608_v63  ;;  %v923_v6 = vpop.f32.mrb[18].mxu0  ;;  %v964_v9 = vpop.f32.mrb[18].mxu1  ;;  %v1103_v15 = vmul.f32 %v1610_v0, %v1610_v0 }
 0x510   :  { %v924_v56 = vpop.f32.mrb[19].mxu0  ;;  %v965_v12 = vpop.f32.mrb[19].mxu1 }
 0x511   :  { %v1109_v13 = vadd.f32 %v1101_v4, %v1100_v2  ;;  %v1090_v14 = vadd.f32 %v1089_v3, %v1604_v62 }
 0x513   :  { %v1110_v16 = vadd.f32 %v1109_v13, %v1102_v1  ;;  %v1091_v18 = vadd.f32 %v1090_v14, %v1610_v0 }
 0x515   :  { %v1111_v19 = vadd.f32 %v1110_v16, %v1103_v15  ;;  %v1001_v8 = vpop.f32.mrb[20].mxu0  ;;  %v1042_v20 = vpop.f32.mrb[20].mxu1 }
 0x516   :  { %v1092_v11 = vadd.f32 %v1091_v18, %v1001_v8  ;;  %v1104_v10 = vmul.f32 %v1001_v8, %v1001_v8  ;;  %v1003_v21 = vpop.f32.mrb[21].mxu0  ;;  %v1044_v22 = vpop.f32.mrb[21].mxu1  ;;  %v1106_v26 = vmul.f32 %v1042_v20, %v1042_v20 }
 0x517   :  { %v1105_v23 = vmul.f32 %v1003_v21, %v1003_v21  ;;  %v1005_v24 = vpop.f32.mrb[22].mxu0  ;;  %v1046_v41 = vpop.f32.mrb[22].mxu1  ;;  %v1107_v59 = vmul.f32 %v1044_v22, %v1044_v22 }
 0x518   :  { %v1112_v45 = vadd.f32 %v1111_v19, %v1104_v10  ;;  %v1093_v30 = vadd.f32 %v1092_v11, %v1003_v21  ;;  %v1006_v27 = vpop.f32.mrb[23].mxu0  ;;  %v1047_v28 = vpop.f32.mrb[23].mxu1 }
 0x51a   :  { %v1113_v31 = vadd.f32 %v1112_v45, %v1105_v23  ;;  %v1094_v32 = vadd.f32 %v1093_v30, %v1042_v20 }
 0x51c   :  { %v1095_v29 = vadd.f32 %v1094_v32, %v1044_v22  ;;  %v1114_v5 = vadd.f32 %v1113_v31, %v1106_v26 }
 0x51d   :  { %v1083_v33 = vpop.f32.mrb[24].mxu0 }
 0x51e   :  { %v1096_v17 = vadd.f32 %v1095_v29, %v1083_v33  ;;  %v1108_v36 = vmul.f32 %v1083_v33, %v1083_v33  ;;  %v1115_v37 = vadd.f32 %v1114_v5, %v1107_v59  ;;  %v1252_v38 = vpop.f32.mrb[25].mxu0 }
 0x51f   :  { %v1086_v39 = vpop.f32.mrb[26].mxu0 }
 0x520   :  { %1097 = vadd.xlane.f32.xlu1 %v1096_v17  ;;  %v1116_v40 = vadd.f32 %v1115_v37, %v1108_v36  ;;  %v1253_v34 = vpop.f32.mrb[27].mxu0 }
 0x522   :  { %1117 = vadd.xlane.f32.xlu0 %v1116_v40 }
 0x531   :  { %1145 = vperm.xlu1 %1271, %v1142_v42  }
 0x535   :  { %1272 = vset.pattern.permute.xlu1 %v1294_v7 }
 0x536   :  { %1158 = vperm.xlu1 %1272, %v1142_v42  }
 0x5ad   :  { %v1098_v43 = vpop.xlane.xlu1 %1097 }
 0x5ae   :  { %v1099_v44 = vmul.f32 0.00086805556, %v1098_v43 }
 0x5af   :  { %v1118_v46 = vpop.xlane.xlu0 %1117 }
 0x5b0   :  { %v1119_v47 = vmul.f32 0.00086805556, %v1118_v46  ;;  %v1120_v25 = vmul.f32 %v1099_v44, %v1099_v44  ;;  %v1122_v51 = vsub.f32 %v1602_v61, %v1099_v44  ;;  %v1123_v35 = vsub.f32 %v1608_v63, %v1099_v44 }
 0x5b1   :  { %v1146_v50 = vpop.permute.xlu1 %1145  ;;  %v1124_v52 = vsub.f32 %v1604_v62, %v1099_v44  ;;  %v1125_v53 = vsub.f32 %v1610_v0, %v1099_v44  ;;  %v1126_v54 = vsub.f32 %v1001_v8, %v1099_v44  ;;  %v1127_v55 = vsub.f32 %v1003_v21, %v1099_v44 }
 0x5b2   :  { %v1121_v48 = vsub.f32 %v1119_v47, %v1120_v25  ;;  %v1128_v57 = vsub.f32 %v1042_v20, %v1099_v44  ;;  %v1129_v58 = vsub.f32 %v1044_v22, %v1099_v44  ;;  %v1130_v60 = vsub.f32 %v1083_v33, %v1099_v44 }
 0x5b4   :  { %v1131_v49 = vadd.f32 1e-05, %v1121_v48 }
 0x5b5   :  { %v1159_v12 = vpop.permute.xlu1 %1158 }
 0x5b6   :  { %1288 = vrsqrt.f32 %v1131_v49 }
 0x5c0   :  { %v1289_v7 = vpop.eup %1288 }
 0x5c1   :  { %v1133_v2 = vmul.f32 %v1289_v7, %v1122_v51  ;;  %v1134_v3 = vmul.f32 %v1289_v7, %v1123_v35  ;;  %v1135_v4 = vmul.f32 %v1289_v7, %v1124_v52  ;;  %v1136_v1 = vmul.f32 %v1289_v7, %v1125_v53 }
 0x5c2   :  { %v1137_v6 = vmul.f32 %v1289_v7, %v1126_v54  ;;  %v1138_v9 = vmul.f32 %v1289_v7, %v1127_v55  ;;  %v1139_v56 = vmul.f32 %v1289_v7, %v1128_v57  ;;  %v1140_v61 = vmul.f32 %v1289_v7, %v1129_v58 }
 0x5c3   :  { %v1141_v63 = vmul.f32 %v1289_v7, %v1130_v60  ;;  %v1148_v13 = vmul.f32 %v1146_v50, %v1133_v2  ;;  %v1149_v62 = vmul.f32 %v1146_v50, %v1134_v3  ;;  %v1150_v14 = vmul.f32 %v1146_v50, %v1135_v4 }
 0x5c4   :  { %v1151_v0 = vmul.f32 %v1146_v50, %v1136_v1  ;;  %v1152_v15 = vmul.f32 %v1146_v50, %v1137_v6  ;;  %v1153_v16 = vmul.f32 %v1146_v50, %v1138_v9  ;;  %v1154_v18 = vmul.f32 %v1146_v50, %v1139_v56 }
 0x5c5   :  { %v1155_v19 = vmul.f32 %v1146_v50, %v1140_v61  ;;  %v1156_v8 = vmul.f32 %v1146_v50, %v1141_v63  ;;  %v1161_v20 = vadd.f32 %v1159_v12, %v1148_v13  ;;  %v1162_v11 = vadd.f32 %v1159_v12, %v1149_v62 }
 0x5c6   :  { %v1163_v10 = vadd.f32 %v1159_v12, %v1150_v14  ;;  %v1164_v21 = vadd.f32 %v1159_v12, %v1151_v0  ;;  %v1165_v22 = vadd.f32 %v1159_v12, %v1152_v15  ;;  %v1166_v23 = vadd.f32 %v1159_v12, %v1153_v16 }
 0x5c7   :  { %v1167_v24 = vadd.f32 %v1159_v12, %v1154_v18  ;;  %v1168_v41 = vadd.f32 %v1159_v12, %v1155_v19  ;;  %v1169_v45 = vadd.f32 %v1159_v12, %v1156_v8  ;;  %v1170_v30 = vmax.f32 %v1161_v20, 0.0 }
 0x5c8   :  { %v1171_v26 = vmax.f32 %v1162_v11, 0.0  ;;  %v1172_v27 = vmax.f32 %v1163_v10, 0.0  ;;  %v1173_v28 = vmax.f32 %v1164_v21, 0.0  ;;  %v1174_v31 = vmax.f32 %v1165_v22, 0.0 }
 0x5c9   :  { %v1175_v32 = vmax.f32 %v1166_v23, 0.0  ;;  %v1176_v59 = vmax.f32 %v1167_v24, 0.0  ;;  %v1177_v29 = vmax.f32 %v1168_v41, 0.0  ;;  %v1178_v5 = vmax.f32 %v1169_v45, 0.0  ;;  %1179 = vst [vmem:[%s1664_s7] sm:$0xff] %v1170_v30 }
 0x5ca   :  { %1180 = vst [vmem:[%s1664_s7 + $0x8] sm:$0xff] %v1171_v26  ;;  %1181 = vst [vmem:[%s1664_s7 + $0x10] sm:$0xff] %v1172_v27 }
 0x5cb   :  { %1182 = vst [vmem:[%s1664_s7 + $0x18] sm:$0xff] %v1173_v28  ;;  %1183 = vst [vmem:[%s1664_s7 + $0x20] sm:$0xff] %v1174_v31 }
 0x5cc   :  { %1184 = vst [vmem:[%s1664_s7 + $0x28] sm:$0xff] %v1175_v32  ;;  %1185 = vst [vmem:[%s1664_s7 + $0x30] sm:$0xff] %v1176_v59 }
 0x5cd   :  { %1186 = vst [vmem:[%s1664_s7 + $0x38] sm:$0xff] %v1177_v29  ;;  %1187 = vst [vmem:[%s1664_s7 + $0x40] sm:$0xff] %v1178_v5 }

</bundles_post_ra>
